<compile_context>
chip_gen: v5e
topology: v5e:2x2
jax: 0.10.0
libtpu: 0.0.40
codegen_flags: <defaults>
</compile_context>

<pallas_src>
from functools import partial

import jax
import jax.numpy as jnp
import numpy as np
from jax.experimental import pallas as pl
from jax.experimental.pallas import tpu as pltpu


_SUBLANE_GRANULE = {4: 8, 2: 16, 1: 32}     # f32/i32, bf16/f16, int8/fp8
_TARGET_BLOCK_BYTES = 4 * 1024 * 1024       # ~4 MiB blocks: good on v5e/v6e/v7x
_VMEM_LIMIT_BYTES = 32 * 1024 * 1024        # headroom for 4 double-buffered tiles


def _identity_kernel(x_ref, o_ref):
    # Pure pass-through: load the VMEM tile, store it to the output tile.
    o_ref[...] = x_ref[...]


def _lane_dense_2d(total):
    """(rows, lanes) with lanes a large multiple of 128, or None if impossible."""
    for lanes in (1024, 512, 256, 128):
        if total % lanes == 0:
            return total // lanes, lanes
    return None


def _row_tile(rows, lanes, itemsize):
    """Row tile aligned to the dtype's sublane granule, sized to ~4 MiB."""
    granule = _SUBLANE_GRANULE.get(itemsize, 8)
    max_rows = max(granule, _TARGET_BLOCK_BYTES // max(1, lanes * itemsize))
    tile = max(granule, (max_rows // granule) * granule)
    if rows <= tile:
        return rows  # single full-extent block — always legal
    return tile


def _elem_tile(total, itemsize):
    """1D element tile: multiple of 8*128 (lane-dense), sized to ~4 MiB."""
    granule = 8 * 128
    if total <= granule:
        return total  # block equal to the full array dim — always legal
    target = max(granule, _TARGET_BLOCK_BYTES // max(1, itemsize))
    return max(granule, (min(target, total) // granule) * granule)


@partial(jax.jit, donate_argnums=(0,))
def decoder_forward(x):
    """Identity forward of `Decoder` as an aliased, lane-dense Pallas copy.

    The input buffer is donated and aliased to the output, so the kernel does
    a single read + write of the same HBM buffer (the minimum for a kernel
    that must materialize an output) with no extra allocation or defensive copy.
    """
    if x.size == 0:
        return x

    orig_shape = x.shape
    dtype = x.dtype
    total = x.size
    itemsize = jnp.dtype(dtype).itemsize

    cparams = pltpu.CompilerParams(
        dimension_semantics=("parallel",),
        vmem_limit_bytes=_VMEM_LIMIT_BYTES,
    )

    shape2d = _lane_dense_2d(total)
    if shape2d is not None:
        # Lane-dense 2D path: lanes is a large multiple of 128 -> unmasked vst.
        rows, lanes = shape2d
        x2 = x.reshape(rows, lanes)
        tile = _row_tile(rows, lanes, itemsize)
        out = pl.pallas_call(
            _identity_kernel,
            out_shape=jax.ShapeDtypeStruct((rows, lanes), dtype),
            grid=(pl.cdiv(rows, tile),),
            in_specs=[pl.BlockSpec((tile, lanes), lambda i: (i, 0))],
            out_specs=pl.BlockSpec((tile, lanes), lambda i: (i, 0)),
            input_output_aliases={0: 0},
            compiler_params=cparams,
        )(x2)
    else:
        # Fallback: flatten to 1D, lane-dense (8*128)-granular blocks; only the
        # final ragged block is masked by Pallas.
        x1 = x.reshape(total)
        tile = _elem_tile(total, itemsize)
        out = pl.pallas_call(
            _identity_kernel,
            out_shape=jax.ShapeDtypeStruct((total,), dtype),
            grid=(pl.cdiv(total, tile),),
            in_specs=[pl.BlockSpec((tile,), lambda i: (i,))],
            out_specs=pl.BlockSpec((tile,), lambda i: (i,)),
            input_output_aliases={0: 0},
            compiler_params=cparams,
        )(x1)

    return out.reshape(orig_shape)


if __name__ == "__main__":
    key = jax.random.PRNGKey(0)
    # Small NCHW-style input consistent with a conv-style decoder.
    x = jax.random.normal(key, (2, 4, 16, 16), dtype=jnp.float32)

    # Host-side reference copy BEFORE the call: x's buffer is donated to the
    # kernel output, so x must not be reused afterwards.
    x_host = np.asarray(jax.device_get(x))

    y = decoder_forward(x)
    y = jax.block_until_ready(y)

    assert y.shape == x_host.shape and y.dtype == x_host.dtype
    assert np.array_equal(np.asarray(jax.device_get(y)), x_host)
    print("KERNEL_OK")
</pallas_src>

<mosaic_0001>
module attributes {stable_mosaic.version = 11 : i64} {
  func.func @_identity_kernel(%arg0: i32, %arg1: memref<2x1024xf32, #tpu.memory_space<vmem>>, %arg2: memref<2x1024xf32, #tpu.memory_space<vmem>>) attributes {dimension_semantics = [#tpu.dimension_semantics<parallel>], iteration_bounds = array<i64: 1>, scalar_prefetch = 0 : i64, scratch_operands = 0 : i64, tpu.core_type = #tpu.core_type<tc>, window_params = [{transform_indices = @transform_0, window_bounds = array<i64: 2, 1024>}, {transform_indices = @transform_1, window_bounds = array<i64: 2, 1024>}]} {
    %c0 = arith.constant 0 : index
    %c0_0 = arith.constant 0 : index
    %0 = vector.load %arg1[%c0, %c0_0] : memref<2x1024xf32, #tpu.memory_space<vmem>>, vector<2x1024xf32>
    %c0_1 = arith.constant 0 : index
    %c0_2 = arith.constant 0 : index
    %1 = vector.load %arg2[%c0_1, %c0_2] : memref<2x1024xf32, #tpu.memory_space<vmem>>, vector<2x1024xf32>
    tpu.vector_store %arg2[%c0_1, %c0_2], %0 {strides = array<i32>} : memref<2x1024xf32, #tpu.memory_space<vmem>>, vector<2x1024xf32>,
    return
  }
  func.func @transform_0(%arg0: i32) -> (i32, i32) {
    %c0_i32 = arith.constant 0 : i32
    %c0_i32_0 = arith.constant 0 : i32
    return %arg0, %c0_i32 : i32, i32
  }
  func.func @transform_1(%arg0: i32) -> (i32, i32) {
    %c0_i32 = arith.constant 0 : i32
    %c0_i32_0 = arith.constant 0 : i32
    return %arg0, %c0_i32 : i32, i32
  }
}

</mosaic_0001>

<bundles_post_ra>
// kernel: decoder_forward.1
= control target key start
LH: loop header
LB: loop body
LE: loop exit
PB: predicated region body
PF: predicated region fallthrough
CT: control target
= control target key end

     0   :  { %s38_s0 = inlined_call_operand.vmem [shape: f32[2,1024], index: 0, kind: input, shape index: {}, may-alias: {0,1}]   ;;  %s39_s1 = inlined_call_operand.vmem [shape: f32[2,1024], index: 1, kind: output, shape index: {}, may-alias: {0,1}]  }
   0x1   :  { %v8_v0 = vld [vmem:[%s38_s0] sm:$0xff]  ;;  %v9_v1 = vld [vmem:[%s38_s0 + $0x8] sm:$0xff] }
   0x2   :  { %10 = vst [vmem:[%s39_s1] sm:$0xff] %v8_v0 }
   0x3   :  { %11 = vst [vmem:[%s39_s1 + $0x8] sm:$0xff] %v9_v1 }

</bundles_post_ra>
